<compile_context>
chip_gen: v7x
topology: tpu7x:2x2x1
jax: 0.10.0
libtpu: 0.0.40
codegen_flags: <defaults>
</compile_context>

<pallas_src>
import jax
import jax.numpy as jnp
from jax.experimental import pallas as pl
from jax.experimental.pallas import tpu as pltpu


def _round_up(x, m):
    return (x + m - 1) // m * m


def _cls_head_kernel(x_ref, w1_ref, b1_ref, w2_ref, b2_ref, o_ref, acc_ref):
    # x_ref:  [tm, H]   CLS-token features (native dtype; cast in-VMEM below)
    # w1_ref: [H, tn]   dense-weight slab (compute dtype, pre-transposed in x out)
    # b1_ref: [1, tn]   dense-bias slab (f32)
    # w2_ref: [tn, Cp]  out_proj-weight slab (compute dtype, lane-padded)
    # b2_ref: [1, Cp]   out_proj bias (f32, lane-padded)
    # o_ref:  [tm, Cp]  logits tile (lane-dense stores)
    # acc_ref:[tm, Cp]  f32 accumulator scratch (lives across the d axis)
    d = pl.program_id(1)

    @pl.when(d == 0)
    def _():
        acc_ref[...] = jnp.zeros_like(acc_ref)

    # Cheap in-VMEM cast of the small CLS tile to the MXU fast-path dtype
    # (avoids re-materializing the whole features tensor in the wrapper).
    x = x_ref[...].astype(w1_ref.dtype)

    # dense slab: [tm, H] @ [H, tn] -> f32, bias + tanh epilogue in f32.
    h = jnp.dot(x, w1_ref[...], preferred_element_type=jnp.float32)
    h = jnp.tanh(h + b1_ref[...])

    # out_proj slab: [tm, tn] @ [tn, Cp] accumulated into the f32 scratch.
    acc_ref[...] += jnp.dot(h.astype(w2_ref.dtype), w2_ref[...],
                            preferred_element_type=jnp.float32)

    @pl.when(d == pl.num_programs(1) - 1)
    def _():
        o_ref[...] = (acc_ref[...] + b2_ref[...]).astype(o_ref.dtype)


def roberta_classification_head(features, w_dense, b_dense, w_out, b_out, *,
                                tm=None, tn=None,
                                compute_dtype=jnp.bfloat16):
    """features: [B, T, H]; weights pre-transposed [in, out]; returns [B, C]."""
    # TODO(synk): pooler_dropout is identity in eval mode; no in-kernel dropout.
    B, T, H = features.shape
    D = w_dense.shape[1]
    C = w_out.shape[1]

    # ---- lane-dense output: pad classes to exactly one 128-lane tile ----
    # (no further padding: it would only double W2 DMA bytes).
    Cp = max(128, _round_up(C, 128))

    # ---- D (inner_dim) slab size for streamed weights ----
    if tn is None:
        tn = min(_round_up(D, 128), 1024)
    Dp = _round_up(D, tn)

    # ---- weights in compute dtype, zero-padded so padded slabs add 0 ----
    # tanh(0 @ x + 0) = 0 and the padded W2 rows are 0, so the padded part of
    # the D reduction contributes exactly zero.
    w1 = jnp.zeros((H, Dp), dtype=compute_dtype).at[:, :D].set(
        w_dense.astype(compute_dtype))
    b1 = jnp.zeros((1, Dp), dtype=jnp.float32).at[:, :D].set(
        b_dense.astype(jnp.float32)[None, :])
    w2 = jnp.zeros((Dp, Cp), dtype=compute_dtype).at[:D, :C].set(
        w_out.astype(compute_dtype))
    b2 = jnp.zeros((1, Cp), dtype=jnp.float32).at[:, :C].set(
        b_out.astype(jnp.float32)[None, :])

    # ---- batch tiling: NO padding of the features view ----
    # Partial last batch block is masked by Pallas; OOB input rows only feed
    # output rows that are never stored.
    if tm is None:
        # NOTE(v7x): for large compute-bound B, tm = round_up(cdiv(B, 2), 8)
        # gives each TensorCore a batch tile; for small weight-BW-bound B a
        # single batch tile avoids doubling weight HBM reads.
        tm = B if B <= 256 else 256
    n_btiles = pl.cdiv(B, tm)

    # ---- fuse the CLS slice into the kernel DMA where possible ----
    # Free reshape [B, T, H] -> [B, T*H]; a (tm, H) block at column-block 0
    # reads exactly the T=0 rows from HBM (strided DMA), no extra XLA pass.
    if H % 128 == 0:
        x2d = features.reshape(B, T * H)
    else:
        x2d = features[:, 0, :]          # fallback: small [B, H] slice in JAX glue

    f_isz = jnp.dtype(features.dtype).itemsize
    w_isz = jnp.dtype(compute_dtype).itemsize
    cost = pl.CostEstimate(
        flops=2 * B * (H * Dp + Dp * Cp),
        transcendentals=B * Dp,
        bytes_accessed=int(B * H * f_isz                 # CLS rows only
                           + (H * Dp + Dp * Cp) * w_isz  # streamed weights
                           + (Dp + Cp) * 4               # biases (f32)
                           + B * Cp * f_isz),            # logits
    )

    out = pl.pallas_call(
        _cls_head_kernel,
        out_shape=jax.ShapeDtypeStruct((B, Cp), features.dtype),
        grid_spec=pltpu.PrefetchScalarGridSpec(
            num_scalar_prefetch=0,
            grid=(n_btiles, Dp // tn),
            in_specs=[
                pl.BlockSpec((tm, H), lambda i, d: (i, 0)),    # CLS rows (resident over d)
                pl.BlockSpec((H, tn), lambda i, d: (0, d)),    # W1 slab (streamed)
                pl.BlockSpec((1, tn), lambda i, d: (0, d)),    # b1 slab
                pl.BlockSpec((tn, Cp), lambda i, d: (d, 0)),   # W2 slab (streamed)
                pl.BlockSpec((1, Cp), lambda i, d: (0, 0)),    # b2 (resident)
            ],
            out_specs=pl.BlockSpec((tm, Cp), lambda i, d: (i, 0)),
            scratch_shapes=[pltpu.VMEM((tm, Cp), jnp.float32)],
        ),
        compiler_params=pltpu.CompilerParams(
            # batch tiles independent -> megacore sharding on v7x; D axis is
            # the reduction carried in the accumulator.
            dimension_semantics=("parallel", "arbitrary"),
            # Streamed-slab working set is ~25 MiB at H=4096/tn=1024/tm=256;
            # raise the scoped limit so v5e's smaller default also compiles.
            vmem_limit_bytes=64 * 1024 * 1024,
        ),
        cost_estimate=cost,
    )(x2d, w1, b1, w2, b2)

    return out[:, :C]


if __name__ == "__main__":
    # Small shapes consistent with the module's forward:
    #   features: [batch=2, seq=8, hidden=128]
    #   dense: 128 -> 128 (inner_dim), out_proj: 128 -> 4 (num_classes)
    B, T, H = 2, 8, 128
    inner_dim = 128
    num_classes = 4

    key = jax.random.PRNGKey(0)
    k_feat, k_w1, k_b1, k_w2, k_b2 = jax.random.split(key, 5)

    features = jax.random.normal(k_feat, (B, T, H), dtype=jnp.float32)

    # Deterministic synthetic parameters (stored transposed: [in, out]).
    w_dense = jax.random.normal(k_w1, (H, inner_dim), dtype=jnp.float32) * 0.02
    b_dense = jax.random.normal(k_b1, (inner_dim,), dtype=jnp.float32) * 0.02
    w_out = jax.random.normal(k_w2, (inner_dim, num_classes), dtype=jnp.float32) * 0.02
    b_out = jax.random.normal(k_b2, (num_classes,), dtype=jnp.float32) * 0.02

    # Reference in plain JAX (same semantics as the PyTorch forward, eval mode).
    x_cls = features[:, 0, :]
    ref = jnp.tanh(x_cls @ w_dense + b_dense) @ w_out + b_out

    # 1) f32 compute path: must match the reference tightly.
    logits_f32 = roberta_classification_head(
        features, w_dense, b_dense, w_out, b_out, compute_dtype=jnp.float32)
    jax.block_until_ready(logits_f32)
    assert logits_f32.shape == (B, num_classes)
    assert jnp.allclose(logits_f32, ref, atol=1e-5, rtol=1e-5), (
        float(jnp.max(jnp.abs(logits_f32 - ref))))

    # 2) default bf16 compute path (production config): looser tolerance.
    logits_bf16 = roberta_classification_head(
        features, w_dense, b_dense, w_out, b_out)
    jax.block_until_ready(logits_bf16)
    assert logits_bf16.shape == (B, num_classes)
    assert jnp.allclose(logits_bf16, ref, atol=2e-2, rtol=2e-2), (
        float(jnp.max(jnp.abs(logits_bf16 - ref))))

    print("KERNEL_OK")
</pallas_src>

<mosaic_0001>
module attributes {stable_mosaic.version = 11 : i64} {
  func.func @_cls_head_kernel(%arg0: i32, %arg1: i32, %arg2: memref<2x128xf32, #tpu.memory_space<vmem>>, %arg3: memref<128x128xf32, #tpu.memory_space<vmem>>, %arg4: memref<1x128xf32, #tpu.memory_space<vmem>>, %arg5: memref<128x128xf32, #tpu.memory_space<vmem>>, %arg6: memref<1x128xf32, #tpu.memory_space<vmem>>, %arg7: memref<2x128xf32, #tpu.memory_space<vmem>>, %arg8: memref<2x128xf32, #tpu.memory_space<vmem>>) attributes {dimension_semantics = [#tpu.dimension_semantics<parallel>, #tpu.dimension_semantics<arbitrary>], iteration_bounds = array<i64: 1, 1>, scalar_prefetch = 0 : i64, scratch_operands = 1 : i64, tpu.core_type = #tpu.core_type<tc>, window_params = [{transform_indices = @transform_0, window_bounds = array<i64: 2, 128>}, {transform_indices = @transform_1, window_bounds = array<i64: 128, 128>}, {transform_indices = @transform_2, window_bounds = array<i64: 1, 128>}, {transform_indices = @transform_3, window_bounds = array<i64: 128, 128>}, {pipeline_mode = #tpu.pipeline_mode<synchronous>, transform_indices = @transform_4, window_bounds = array<i64: 1, 128>}, {transform_indices = @transform_5, window_bounds = array<i64: 2, 128>}]} {
    %c0_i32 = arith.constant 0 : i32
    %0 = arith.cmpi eq, %arg1, %c0_i32 : i32
    %1 = arith.extui %0 : i1 to i32
    %c0_i32_0 = arith.constant 0 : i32
    %2 = arith.cmpi ne, %1, %c0_i32_0 : i32
    scf.if %2 {
      %cst_15 = arith.constant 0.000000e+00 : f32
      %18 = vector.broadcast %cst_15 : f32 to vector<2x128xf32>
      %c0_16 = arith.constant 0 : index
      %c0_17 = arith.constant 0 : index
      %19 = vector.load %arg8[%c0_16, %c0_17] : memref<2x128xf32, #tpu.memory_space<vmem>>, vector<2x128xf32>
      tpu.vector_store %arg8[%c0_16, %c0_17], %18 {strides = array<i32>} : memref<2x128xf32, #tpu.memory_space<vmem>>, vector<2x128xf32>,
    } else {
    }
    %c0 = arith.constant 0 : index
    %c0_1 = arith.constant 0 : index
    %3 = vector.load %arg2[%c0, %c0_1] : memref<2x128xf32, #tpu.memory_space<vmem>>, vector<2x128xf32>
    %c0_2 = arith.constant 0 : index
    %c0_3 = arith.constant 0 : index
    %4 = vector.load %arg3[%c0_2, %c0_3] : memref<128x128xf32, #tpu.memory_space<vmem>>, vector<128x128xf32>
    %cst = arith.constant dense<0.000000e+00> : vector<2x128xf32>
    %5 = tpu.matmul %3, %4, %cst {dimension_numbers = #tpu.dot_dimension_numbers<[1], [0], [0], [1], [0, 0, 1, 1], [], []>} : vector<2x128xf32>, vector<128x128xf32>, vector<2x128xf32> -> vector<2x128xf32>
    %c0_4 = arith.constant 0 : index
    %c0_5 = arith.constant 0 : index
    %6 = vector.load %arg4[%c0_4, %c0_5] : memref<1x128xf32, #tpu.memory_space<vmem>>, vector<1x128xf32>
    %7 = vector.broadcast %6 : vector<1x128xf32> to vector<2x128xf32>
    %8 = arith.addf %5, %7 : vector<2x128xf32>
    %9 = math.tanh %8 : vector<2x128xf32>
    %c0_6 = arith.constant 0 : index
    %c0_7 = arith.constant 0 : index
    %10 = vector.load %arg8[%c0_6, %c0_7] : memref<2x128xf32, #tpu.memory_space<vmem>>, vector<2x128xf32>
    %c0_8 = arith.constant 0 : index
    %c0_9 = arith.constant 0 : index
    %11 = vector.load %arg5[%c0_8, %c0_9] : memref<128x128xf32, #tpu.memory_space<vmem>>, vector<128x128xf32>
    %cst_10 = arith.constant dense<0.000000e+00> : vector<2x128xf32>
    %12 = tpu.matmul %9, %11, %cst_10 {dimension_numbers = #tpu.dot_dimension_numbers<[1], [0], [0], [1], [0, 0, 1, 1], [], []>} : vector<2x128xf32>, vector<128x128xf32>, vector<2x128xf32> -> vector<2x128xf32>
    %13 = arith.addf %10, %12 : vector<2x128xf32>
    %c0_11 = arith.constant 0 : index
    %c0_12 = arith.constant 0 : index
    %14 = vector.load %arg8[%c0_11, %c0_12] : memref<2x128xf32, #tpu.memory_space<vmem>>, vector<2x128xf32>
    tpu.vector_store %arg8[%c0_11, %c0_12], %13 {strides = array<i32>} : memref<2x128xf32, #tpu.memory_space<vmem>>, vector<2x128xf32>,
    %c0_i32_13 = arith.constant 0 : i32
    %15 = arith.cmpi eq, %arg1, %c0_i32_13 : i32
    %16 = arith.extui %15 : i1 to i32
    %c0_i32_14 = arith.constant 0 : i32
    %17 = arith.cmpi ne, %16, %c0_i32_14 : i32
    scf.if %17 {
      %c0_15 = arith.constant 0 : index
      %c0_16 = arith.constant 0 : index
      %18 = vector.load %arg8[%c0_15, %c0_16] : memref<2x128xf32, #tpu.memory_space<vmem>>, vector<2x128xf32>
      %c0_17 = arith.constant 0 : index
      %c0_18 = arith.constant 0 : index
      %19 = vector.load %arg6[%c0_17, %c0_18] : memref<1x128xf32, #tpu.memory_space<vmem>>, vector<1x128xf32>
      %20 = vector.broadcast %19 : vector<1x128xf32> to vector<2x128xf32>
      %21 = arith.addf %18, %20 : vector<2x128xf32>
      %c0_19 = arith.constant 0 : index
      %c0_20 = arith.constant 0 : index
      %22 = vector.load %arg7[%c0_19, %c0_20] : memref<2x128xf32, #tpu.memory_space<vmem>>, vector<2x128xf32>
      tpu.vector_store %arg7[%c0_19, %c0_20], %21 {strides = array<i32>} : memref<2x128xf32, #tpu.memory_space<vmem>>, vector<2x128xf32>,
    } else {
    }
    return
  }
  func.func @transform_0(%arg0: i32, %arg1: i32) -> (i32, i32) {
    %c0_i32 = arith.constant 0 : i32
    %c0_i32_0 = arith.constant 0 : i32
    return %arg0, %c0_i32 : i32, i32
  }
  func.func @transform_1(%arg0: i32, %arg1: i32) -> (i32, i32) {
    %c0_i32 = arith.constant 0 : i32
    %c0_i32_0 = arith.constant 0 : i32
    return %c0_i32, %arg1 : i32, i32
  }
  func.func @transform_2(%arg0: i32, %arg1: i32) -> (i32, i32) {
    %c0_i32 = arith.constant 0 : i32
    %c0_i32_0 = arith.constant 0 : i32
    return %c0_i32, %arg1 : i32, i32
  }
  func.func @transform_3(%arg0: i32, %arg1: i32) -> (i32, i32) {
    %c0_i32 = arith.constant 0 : i32
    %c0_i32_0 = arith.constant 0 : i32
    return %arg1, %c0_i32 : i32, i32
  }
  func.func @transform_4(%arg0: i32, %arg1: i32) -> (i32, i32) {
    %c0_i32 = arith.constant 0 : i32
    %c0_i32_0 = arith.constant 0 : i32
    %c0_i32_1 = arith.constant 0 : i32
    return %c0_i32, %c0_i32_0 : i32, i32
  }
  func.func @transform_5(%arg0: i32, %arg1: i32) -> (i32, i32) {
    %c0_i32 = arith.constant 0 : i32
    %c0_i32_0 = arith.constant 0 : i32
    return %arg0, %c0_i32 : i32, i32
  }
}

</mosaic_0001>

<bundles_post_ra>
// kernel: tpu_custom_call.1
= control target key start
LH: loop header
LB: loop body
LE: loop exit
PB: predicated region body
PF: predicated region fallthrough
CT: control target
= control target key end

     0   :  { %10 = vsyncpa [#allocation4], 0  ;;  %s741_s0 = inlined_call_operand.hbm [shape: f32[2,1024], index: 0, kind: input, shape index: {}]   ;;  %s742_s1 = inlined_call_operand.hbm [shape: f32[128,128], index: 1, kind: input, shape index: {}]   ;;  %s743_s2 = inlined_call_operand.hbm [shape: f32[1,128], index: 2, kind: input, shape index: {}]   ;;  %s744_s3 = inlined_call_operand.hbm [shape: f32[128,128], index: 3, kind: input, shape index: {}]   ;;  %s745_s4 = inlined_call_operand.hbm [shape: f32[1,128], index: 4, kind: input, shape index: {}]   ;;  %s746_s5 = inlined_call_operand.hbm [shape: f32[2,128], index: 5, kind: output, shape index: {}]  }
   0x1   :  { %11 = vsyncpa [#allocation7], 0 }
   0x2   :  { %12 = vsyncpa [#allocation10], 0 }
   0x3   :  { %13 = vsyncpa [#allocation5], 0  ;;  %s609_s18 = smov [#allocation6]   ;;  %s469_s22 = scalar_lea.hbm %s742_s1, 2048 }
   0x4   :  { %s29_s19 = sshll.u32 %s609_s18, 4  ;;  %p470_p0 = scmp.ne.s32.totalorder %s742_s1, %s469_s22  ;;  %s30_s19 = int_to_ptr.vmem [resolvable:$true] %s29_s19 }
   0x5   :  { %p473_p1 = scmp.lt.u32.totalorder %s469_s22, %s742_s1 }
   0x7   :  { %p475_p2 = pnand %p473_p1, %p470_p0 }
   0x9   :  { %478 = shalt.err (!%p475_p2)
}
   0xa   :  { %s479_s27 = scalar_lea.vmem %s30_s19, 2048  ;;  %p484_p4 = scmp.lt.s32.totalorder %s30_s19, %s30_s19 }
   0xb   :  { %p480_p3 = scmp.ne.s32.totalorder %s30_s19, %s479_s27  ;;  %p485_p5 = scmp.lt.s32.totalorder %s479_s27, %s479_s27 }
   0xd   :  { %p486_p6 = por %p485_p5, %p484_p4 }
   0xf   :  { %p487_p7 = pnand %p486_p6, %p480_p3 }
  0x11   :  { %490 = shalt.err (!%p487_p7)
}
  0x12   :  { %s610_s28 = smov 128   ;;  %s611_s29 = smov 8  }
  0x13   :  { %35 = dma.hbm_to_vmem [thread:$0]  %s742_s1, 2048, %s30_s19, [#allocation7], %s610_s28, %s610_s28, %s611_s29  }
  0x14   :  { %s612_s7 = smov [#allocation9]   ;;  %s613_s9 = smov [#allocation3]  }
  0x15   :  { %s51_s8 = sshll.u32 %s612_s7, 4  ;;  %s20_s10 = sshll.u32 %s613_s9, 4  ;;  %s52_s8 = int_to_ptr.vmem [resolvable:$true] %s51_s8  ;;  %s21_s10 = int_to_ptr.vmem [resolvable:$true] %s20_s10 }
  0x16   :  { %s491_s13 = scalar_lea.hbm %s744_s3, 2048 }
  0x17   :  { %p492_p8 = scmp.ne.s32.totalorder %s744_s3, %s491_s13  ;;  %p495_p9 = scmp.lt.u32.totalorder %s491_s13, %s744_s3 }
  0x19   :  { %p497_p10 = pnand %p495_p9, %p492_p8 }
  0x1b   :  { %500 = shalt.err (!%p497_p10)
}
  0x1c   :  { %s501_s1 = scalar_lea.vmem %s52_s8, 2048  ;;  %p506_p12 = scmp.lt.s32.totalorder %s52_s8, %s52_s8 }
  0x1d   :  { %p502_p11 = scmp.ne.s32.totalorder %s52_s8, %s501_s1  ;;  %p507_p13 = scmp.lt.s32.totalorder %s501_s1, %s501_s1 }
  0x1f   :  { %p508_p0 = por %p507_p13, %p506_p12 }
  0x21   :  { %p509_p1 = pnand %p508_p0, %p502_p11 }
  0x23   :  { %512 = shalt.err (!%p509_p1)
}
  0x24   :  { %57 = dma.hbm_to_vmem [thread:$0]  %s744_s3, 2048, %s52_s8, [#allocation10], %s610_s28, %s610_s28, %s611_s29  }
  0x25   :  { %s513_s22 = scalar_lea.hbm %s741_s0, 32  ;;  %s515_s27 = scalar_lea.hbm %s741_s0, 256 }
  0x26   :  { %p514_p2 = scmp.ne.s32.totalorder %s741_s0, %s513_s22  ;;  %p516_p3 = scmp.lt.u32.totalorder %s515_s27, %s513_s22 }
  0x27   :  { %p517_p4 = scmp.lt.u32.totalorder %s513_s22, %s741_s0 }
  0x29   :  { %p518_p5 = por %p517_p4, %p516_p3 }
  0x2b   :  { %p519_p6 = pnand %p518_p5, %p514_p2 }
  0x2d   :  { %522 = shalt.err (!%p519_p6)
}
  0x2e   :  { %s523_s3 = scalar_lea.vmem %s21_s10, 32  ;;  %p528_p8 = scmp.lt.s32.totalorder %s21_s10, %s21_s10 }
  0x2f   :  { %p524_p7 = scmp.ne.s32.totalorder %s21_s10, %s523_s3  ;;  %p529_p9 = scmp.lt.s32.totalorder %s523_s3, %s523_s3 }
  0x31   :  { %p530_p10 = por %p529_p9, %p528_p8 }
  0x33   :  { %p531_p11 = pnand %p530_p10, %p524_p7 }
  0x35   :  { %534 = shalt.err (!%p531_p11)
}
  0x36   :  { %23 = dma.hbm_to_vmem [thread:$0]  %s741_s0, 32, %s21_s10, [#allocation4]  }
  0x37   :  { %s614_s7 = smov [#allocation8]   ;;  %s615_s9 = smov [#allocation11]  }
  0x38   :  { %s42_s8 = sshll.u32 %s614_s7, 4  ;;  %s64_s11 = sshll.u32 %s615_s9, 4  ;;  %s43_s8 = int_to_ptr.vmem [resolvable:$true] %s42_s8  ;;  %s65_s11 = int_to_ptr.vmem [resolvable:$true] %s64_s11 }
  0x39   :  { %s535_s14 = scalar_lea.hbm %s743_s2, 16 }
  0x3a   :  { %p536_p12 = scmp.ne.s32.totalorder %s743_s2, %s535_s14  ;;  %p539_p13 = scmp.lt.u32.totalorder %s535_s14, %s743_s2 }
  0x3c   :  { %p541_p0 = pnand %p539_p13, %p536_p12 }
  0x3e   :  { %544 = shalt.err (!%p541_p0)
}
  0x3f   :  { %s545_s0 = scalar_lea.vmem %s43_s8, 16  ;;  %s549_s10 = scalar_lea.vmem %s43_s8, 32 }
  0x40   :  { %p546_p1 = scmp.ne.s32.totalorder %s43_s8, %s545_s0  ;;  %p550_p2 = scmp.lt.s32.totalorder %s43_s8, %s43_s8 }
  0x41   :  { %p551_p3 = scmp.lt.s32.totalorder %s549_s10, %s545_s0 }
  0x43   :  { %p552_p4 = por %p551_p3, %p550_p2 }
  0x45   :  { %p553_p5 = pnand %p552_p4, %p546_p1 }
  0x47   :  { %556 = shalt.err (!%p553_p5)
}
  0x48   :  { %45 = dma.hbm_to_vmem [thread:$0]  %s743_s2, 16, %s43_s8, [#allocation7]  }
  0x49   :  { %s557_s22 = scalar_lea.hbm %s745_s4, 16 }
  0x4a   :  { %p558_p6 = scmp.ne.s32.totalorder %s745_s4, %s557_s22  ;;  %p561_p7 = scmp.lt.u32.totalorder %s557_s22, %s745_s4 }
  0x4c   :  { %p563_p8 = pnand %p561_p7, %p558_p6 }
  0x4e   :  { %566 = shalt.err (!%p563_p8)
}
  0x4f   :  { %s567_s27 = scalar_lea.vmem %s65_s11, 16  ;;  %s571_s30 = scalar_lea.vmem %s65_s11, 32 }
  0x50   :  { %p568_p9 = scmp.ne.s32.totalorder %s65_s11, %s567_s27  ;;  %p572_p10 = scmp.lt.s32.totalorder %s65_s11, %s65_s11 }
  0x51   :  { %p573_p11 = scmp.lt.s32.totalorder %s571_s30, %s567_s27 }
  0x53   :  { %p574_p12 = por %p573_p11, %p572_p10 }
  0x55   :  { %p575_p13 = pnand %p574_p12, %p568_p9 }
  0x57   :  { %578 = shalt.err (!%p575_p13)
}
  0x58   :  { %67 = dma.hbm_to_vmem [thread:$0]  %s745_s4, 16, %s65_s11, [#allocation10]  }
  0x59   :  { %601 = dma.done.wait [#allocation4], 32  }
  0x5a   :  { %602 = vsyncadd [#allocation4], 4294967264 }
  0x5b   :  { %603 = dma.done.wait [#allocation7], 2064  }
  0x5c   :  { %604 = vsyncadd [#allocation7], 4294965232 }
  0x5d   :  { %605 = dma.done.wait [#allocation10], 2064  }
  0x5e   :  { %606 = vsyncadd [#allocation10], 4294965232  ;;  %v616_v0 = vmov 0.0|0.0   ;;  %v617_v1 = vmov 0.0   ;;  %vm618_vm0 = vmmov 0   ;;  %v89_v2 = vld [vmem:[#allocation6] sm:$0xff] }
  0x5f   :  { %408 = vmatprep.subr.bf16.mxu0 %v616_v0  ;;  %87 = vst [vmem:[#allocation2] sm:$0x3] %v617_v1  ;;  %370 = vmatprep.mubr.msk.f32.mxu0 %vm618_vm0, %v617_v1  ;;  %v90_v3 = vld [vmem:[#allocation6 + $0x8] sm:$0xff]  ;;  %v91_v4 = vld [vmem:[#allocation6 + $0x10] sm:$0xff]  ;;  %v92_v6 = vld [vmem:[#allocation6 + $0x18] sm:$0xff]  ;;  %s619_s4 = smov [#allocation12]  }
  0x60   :  { %432 = vmatprep.subr.bf16.mxu1 %v616_v0  ;;  %405 = vmatprep.mubr.msk.f32.mxu1 %vm618_vm0, %v617_v1  ;;  %v409_v5 = vpack.c.bf16 %v90_v3, %v89_v2  ;;  %v412_v7 = vpack.c.bf16 %v92_v6, %v91_v4  ;;  %v93_v8 = vld [vmem:[#allocation6 + $0x20] sm:$0xff]  ;;  %v94_v9 = vld [vmem:[#allocation6 + $0x28] sm:$0xff]  ;;  %v186_v12 = vld [vmem:[#allocation9 + $0x10] sm:$0xff]  ;;  %s291_s3 = sshll.u32 %s619_s4, 4  ;;  %s292_s3 = int_to_ptr.vmem [resolvable:$true] %s291_s3 }
  0x61   :  { %v184_v10 = vld [vmem:[#allocation9] sm:$0xff]  ;;  %v185_v11 = vld [vmem:[#allocation9 + $0x8] sm:$0xff]  ;;  %v187_v13 = vld [vmem:[#allocation9 + $0x18] sm:$0xff]  ;;  %v415_v14 = vpack.c.bf16 %v94_v9, %v93_v8  ;;  %s579_s28 = scalar_lea.vmem %s292_s3, 32  ;;  %p584_p1 = scmp.lt.s32.totalorder %s292_s3, %s292_s3 }
  0x62   :  { %410 = vmatpush3.bf16.msra.mxu0 %v409_v5  ;;  %v433_v15 = vpack.c.bf16 %v185_v11, %v184_v10  ;;  %v95_v16 = vld [vmem:[#allocation6 + $0x30] sm:$0xff]  ;;  %v96_v17 = vld [vmem:[#allocation6 + $0x38] sm:$0xff]  ;;  %v436_v18 = vpack.c.bf16 %v187_v13, %v186_v12  ;;  %v188_v19 = vld [vmem:[#allocation9 + $0x20] sm:$0xff]  ;;  %p580_p0 = scmp.ne.s32.totalorder %s292_s3, %s579_s28  ;;  %p585_p2 = scmp.lt.s32.totalorder %s579_s28, %s579_s28 }
  0x63   :  { %411 = vmatprep.subr.bf16.mxu0 %v616_v0  ;;  %v189_v20 = vld [vmem:[#allocation9 + $0x28] sm:$0xff]  ;;  %v418_v21 = vpack.c.bf16 %v96_v17, %v95_v16  ;;  %v97_v22 = vld [vmem:[#allocation6 + $0x40] sm:$0xff]  ;;  %v190_v25 = vld [vmem:[#allocation9 + $0x30] sm:$0xff] }
  0x64   :  { %434 = vmatpush3.bf16.msra.mxu1 %v433_v15  ;;  %v98_v23 = vld [vmem:[#allocation6 + $0x48] sm:$0xff]  ;;  %v439_v24 = vpack.c.bf16 %v189_v20, %v188_v19  ;;  %v191_v26 = vld [vmem:[#allocation9 + $0x38] sm:$0xff]  ;;  %v99_v28 = vld [vmem:[#allocation6 + $0x50] sm:$0xff]  ;;  %p586_p3 = por %p585_p2, %p584_p1 }
  0x65   :  { %435 = vmatprep.subr.bf16.mxu1 %v616_v0  ;;  %v421_v27 = vpack.c.bf16 %v98_v23, %v97_v22  ;;  %v100_v29 = vld [vmem:[#allocation6 + $0x58] sm:$0xff]  ;;  %v442_v30 = vpack.c.bf16 %v191_v26, %v190_v25  ;;  %v192_v31 = vld [vmem:[#allocation9 + $0x40] sm:$0xff]  ;;  %v193_v32 = vld [vmem:[#allocation9 + $0x48] sm:$0xff] }
  0x66   :  { %413 = vmatpush3.bf16.msra.mxu0 %v412_v7  ;;  %v424_v33 = vpack.c.bf16 %v100_v29, %v99_v28  ;;  %v101_v34 = vld [vmem:[#allocation6 + $0x60] sm:$0xff]  ;;  %v102_v35 = vld [vmem:[#allocation6 + $0x68] sm:$0xff]  ;;  %v445_v36 = vpack.c.bf16 %v193_v32, %v192_v31  ;;  %v103_v38 = vld [vmem:[#allocation6 + $0x70] sm:$0xff]  ;;  %p587_p4 = pnand %p586_p3, %p580_p0 }
  0x67   :  { %414 = vmatprep.subr.bf16.mxu0 %v616_v0  ;;  %v427_v37 = vpack.c.bf16 %v102_v35, %v101_v34  ;;  %v104_v39 = vld [vmem:[#allocation6 + $0x78] sm:$0xff]  ;;  %v196_v45 = vld [vmem:[#allocation9 + $0x60] sm:$0xff]  ;;  %v197_v46 = vld [vmem:[#allocation9 + $0x68] sm:$0xff] }
  0x68   :  { %437 = vmatpush3.bf16.msra.mxu1 %v436_v18  ;;  %v430_v40 = vpack.c.bf16 %v104_v39, %v103_v38  ;;  %v88_v41 = vld [vmem:[#allocation3] sm:$0x3]  ;;  %v194_v42 = vld [vmem:[#allocation9 + $0x50] sm:$0xff]  ;;  %v451_v47 = vpack.c.bf16 %v197_v46, %v196_v45  ;;  %v302_v51 = vld [vmem:[#allocation8] ss:$0 sm:$0xff] }
  0x69   :  { %438 = vmatprep.subr.bf16.mxu1 %v616_v0  ;;  %v195_v43 = vld [vmem:[#allocation9 + $0x58] sm:$0xff]  ;;  %v198_v48 = vld [vmem:[#allocation9 + $0x70] sm:$0xff]  ;;  %v303_v60 = vld [vmem:[#allocation11] ss:$0 sm:$0xff] }
  0x6a   :  { %416 = vmatpush3.bf16.msra.mxu0 %v415_v14  ;;  %v448_v44 = vpack.c.bf16 %v195_v43, %v194_v42  ;;  %v199_v49 = vld [vmem:[#allocation9 + $0x78] sm:$0xff] }
  0x6b   :  { %417 = vmatprep.subr.bf16.mxu0 %v616_v0  ;;  %v454_v50 = vpack.c.bf16 %v199_v49, %v198_v48  ;;  %v183_v56 = vld [vmem:[#allocation2] sm:$0x3] }
  0x6c   :  { %440 = vmatpush3.bf16.msra.mxu1 %v439_v24 }
  0x6d   :  { %441 = vmatprep.subr.bf16.mxu1 %v616_v0 }
  0x6e   :  { %419 = vmatpush3.bf16.msra.mxu0 %v418_v21 }
  0x6f   :  { %420 = vmatprep.subr.bf16.mxu0 %v616_v0 }
  0x70   :  { %443 = vmatpush3.bf16.msra.mxu1 %v442_v30 }
  0x71   :  { %444 = vmatprep.subr.bf16.mxu1 %v616_v0 }
  0x72   :  { %422 = vmatpush3.bf16.msra.mxu0 %v421_v27 }
  0x73   :  { %423 = vmatprep.subr.bf16.mxu0 %v616_v0 }
  0x74   :  { %446 = vmatpush3.bf16.msra.mxu1 %v445_v36 }
  0x75   :  { %447 = vmatprep.subr.bf16.mxu1 %v616_v0 }
  0x76   :  { %425 = vmatpush3.bf16.msra.mxu0 %v424_v33 }
  0x77   :  { %426 = vmatprep.subr.bf16.mxu0 %v616_v0 }
  0x78   :  { %449 = vmatpush3.bf16.msra.mxu1 %v448_v44 }
  0x79   :  { %450 = vmatprep.subr.bf16.mxu1 %v616_v0 }
  0x7a   :  { %428 = vmatpush3.bf16.msra.mxu0 %v427_v37 }
  0x7b   :  { %429 = vmatprep.subr.bf16.mxu0 %v616_v0 }
  0x7c   :  { %452 = vmatpush3.bf16.msra.mxu1 %v451_v47 }
  0x7d   :  { %453 = vmatprep.subr.bf16.mxu1 %v616_v0 }
  0x7e   :  { %431 = vmatpush3.bf16.msra.mxu0 %v430_v40 }
  0x80   :  { %455 = vmatpush3.bf16.msra.mxu1 %v454_v50 }
  0x81   :  { %371 = vmatmul.mubr.f32.vlgmr.msra.gmra.mrb[0].mxu0 %v88_v41 }
 0x154   :  { %v178_v52 = vpop.f32.mrb[0].mxu0 }
 0x155   :  { %v179_v53 = vadd.f32 %v302_v51, %v178_v52  ;;  %v372_v54 = vpop.f32.mrb[1].mxu0 }
 0x157   :  { %467 = vtanh.f32 %v179_v53 }
 0x161   :  { %v468_v55 = vpop.eup %467 }
 0x162   :  { %406 = vmatmul.mubr.f32.vlgmr.msra.gmra.mrb[0].mxu1 %v468_v55 }
 0x235   :  { %v266_v57 = vpop.f32.mrb[0].mxu1 }
 0x236   :  { %v270_v58 = vadd.f32 %v266_v57, %v183_v56  ;;  %v407_v59 = vpop.f32.mrb[1].mxu1 }
 0x238   :  { %271 = vst [vmem:[#allocation2] sm:$0x3] %v270_v58 }
 0x23f   :  { %v275_v61 = vld [vmem:[#allocation2] sm:$0x3] }
 0x240   :  { %v283_v62 = vadd.f32 %v303_v60, %v275_v61 }
 0x242   :  { %284 = vst [vmem:[#allocation12] sm:$0x3] %v283_v62 }
 0x243   :  { %590 = shalt.err (!%p587_p4)
}
 0x244   :  { %s591_s8 = scalar_lea.hbm %s746_s5, 32 }
 0x245   :  { %p592_p5 = scmp.ne.s32.totalorder %s746_s5, %s591_s8  ;;  %p595_p6 = scmp.lt.u32.totalorder %s591_s8, %s746_s5 }
 0x247   :  { %p597_p7 = pnand %p595_p6, %p592_p5 }
 0x249   :  { %600 = shalt.err (!%p597_p7)
}
 0x24a   :  { %294 = dma.vmem_to_hbm [thread:$0]  %s292_s3, 32, %s746_s5, [#allocation5]  }
 0x24b   :  { %607 = dma.done.wait [#allocation5], 32  }
 0x24c   :  { %608 = vsyncadd [#allocation5], 4294967264 }
 0x24d   :  { %298 = vsyncpa [#allocation4], 1 }
 0x24e   :  { %299 = vsyncpa [#allocation7], 1 }
 0x24f   :  { %300 = vsyncpa [#allocation10], 1 }
 0x250   :  { %301 = vsyncpa [#allocation5], 1 }

</bundles_post_ra>
